<compile_context>
chip_gen: v5e
topology: v5e:2x2
jax: 0.10.0
libtpu: 0.0.40
codegen_flags: <defaults>
</compile_context>

<pallas_src>
import jax
import jax.numpy as jnp
from jax.experimental import pallas as pl
from jax.experimental.pallas import tpu as pltpu


# ---------------------------------------------------------------------------
# Fused Pallas kernel: one row-tile of the whole Fusion forward pass
# ---------------------------------------------------------------------------
def _fusion_kernel(h_ref, d_ref, w1_ref, b1_ref, w2_ref, o_ref):
    h = h_ref[...]                        # (tm, D) f32   hidden rows
    d = d_ref[...]                        # (tm, D) f32   dy_emb rows
    b1 = b1_ref[...]                      # (1, D)  f32   linear1.bias
    w2 = w2_ref[...]                      # (1, D)  f32   linear2.weight (out=1)
    tm = h.shape[0]

    # linear1 for BOTH stack members in one MXU pass:
    #   [h; d] @ W1.T  -- bf16 operands, f32 accumulation, W1 stationary.
    x = jnp.concatenate([h, d], axis=0).astype(jnp.bfloat16)          # (2*tm, D)
    t = jnp.tanh(
        jnp.dot(x, w1_ref[...], preferred_element_type=jnp.float32) + b1
    )                                                                  # (2*tm, D)

    # linear2 (out_features = 1) as a per-row lane reduction.
    # linear2.bias (b2) is added to both scores and cancels in the 2-way
    # softmax, so it is dropped entirely.
    s = jnp.sum(t * w2, axis=-1, keepdims=True)                        # (2*tm, 1)
    s_h = s[:tm]                                                       # (tm, 1)
    s_d = s[tm:]                                                       # (tm, 1)

    # softmax over the 2-way stack dim == exact sigmoid gate (weights sum to 1).
    g = jax.nn.sigmoid(s_h - s_d)                                      # (tm, 1)

    # TODO(synk): nn.Dropout(p) on emb_score implemented as identity
    # (inference / eval mode) for determinism.
    o_ref[...] = g * h + (1.0 - g) * d


# ---------------------------------------------------------------------------
# Row-tile choice: big tiles (HBM-bound), sublane-aligned, >= 2 grid steps
# when possible so v7x's two TensorCores both get work.
# ---------------------------------------------------------------------------
def _choose_tm(n, block_rows):
    block_rows = max(8, (block_rows // 8) * 8)
    if n <= block_rows:
        half = (((n + 1) // 2) + 7) // 8 * 8   # ~n/2, rounded up to sublanes
        if 8 <= half < n:
            return half
        return n                               # single full-extent block
    return block_rows


# ---------------------------------------------------------------------------
# Wrapper: tiling over node rows; weights/biases resident every grid step
# ---------------------------------------------------------------------------
def fusion_forward(params, hidden, dy_emb, *, block_rows=512):
    n, dim = hidden.shape
    assert dy_emb.shape == (n, dim)

    tm = _choose_tm(n, block_rows)
    grid = (pl.cdiv(n, tm),)

    # Pre-transpose and pre-cast the matmul weight once, outside the kernel.
    w1_t = params["w1"].T.astype(jnp.bfloat16)            # (D, D) == W1.T
    b1 = params["b1"].reshape(1, dim).astype(jnp.float32)
    w2 = params["w2"].reshape(1, dim).astype(jnp.float32)
    # params["b2"] cancels in the pairwise softmax -> not passed to the kernel.

    row_spec = pl.BlockSpec((tm, dim), lambda i: (i, 0))
    w1_spec = pl.BlockSpec((dim, dim), lambda i: (0, 0))
    vec_spec = pl.BlockSpec((1, dim), lambda i: (0, 0))

    # Advisory cost hint (bf16 weights, single fused matmul, sigmoid gate).
    flops = 2 * (2 * n) * dim * dim + (2 * n) * 2 * dim + 4 * n * dim
    transcendentals = 2 * n * dim + n
    bytes_accessed = 4 * 3 * n * dim + 2 * dim * dim + 4 * 2 * dim

    # TODO(synk): for D >> 128 add a reduction grid axis over W1 with an f32
    # accumulator (P3) and set vmem_limit_bytes explicitly (v7x has 64 MiB).
    out = pl.pallas_call(
        _fusion_kernel,
        out_shape=jax.ShapeDtypeStruct((n, dim), jnp.float32),
        grid=grid,
        in_specs=[row_spec, row_spec, w1_spec, vec_spec, vec_spec],
        out_specs=row_spec,
        compiler_params=pltpu.CompilerParams(
            dimension_semantics=("parallel",)),
        cost_estimate=pl.CostEstimate(
            flops=int(flops),
            transcendentals=int(transcendentals),
            bytes_accessed=int(bytes_accessed)),
    )(hidden, dy_emb, w1_t, b1, w2)

    return out


# ---------------------------------------------------------------------------
# Deterministic parameter init (shapes / init from Fusion.__init__)
# ---------------------------------------------------------------------------
def init_params(key, input_size, out=1):
    k_w1, k_b1, k_w2, k_b2 = jax.random.split(key, 4)

    # linear1: nn.Linear(D, D), weight xavier_normal_, bias U(-1/sqrt(D), 1/sqrt(D))
    std_w1 = (2.0 / (input_size + input_size)) ** 0.5
    w1 = std_w1 * jax.random.normal(k_w1, (input_size, input_size), jnp.float32)
    bound = 1.0 / (input_size ** 0.5)
    b1 = jax.random.uniform(k_b1, (input_size,), jnp.float32, -bound, bound)

    # linear2: nn.Linear(D, out=1), weight xavier_normal_
    std_w2 = (2.0 / (input_size + out)) ** 0.5
    w2 = std_w2 * jax.random.normal(k_w2, (out, input_size), jnp.float32)
    b2 = jax.random.uniform(k_b2, (out,), jnp.float32, -bound, bound)

    return dict(w1=w1, b1=b1, w2=w2, b2=b2)


# ---------------------------------------------------------------------------
# Pure-JAX reference (eval-mode dropout) for a correctness spot-check
# ---------------------------------------------------------------------------
def _reference(params, hidden, dy_emb):
    emb = jnp.stack([hidden, dy_emb], axis=0)                 # (2, N, D)
    y = jnp.tanh(emb @ params["w1"].T + params["b1"])
    s = y @ params["w2"].T + params["b2"]                     # (2, N, 1)
    p = jax.nn.softmax(s, axis=0)
    return jnp.sum(p * emb, axis=0)                           # (N, D)


if __name__ == "__main__":
    input_size = 128    # feature dim (lane-dense: multiple of 128)
    n = 256             # number of rows in hidden / dy_emb

    key = jax.random.PRNGKey(0)
    k_params, k_h, k_d = jax.random.split(key, 3)

    params = init_params(k_params, input_size)
    hidden = jax.random.normal(k_h, (n, input_size), jnp.float32)
    dy_emb = jax.random.normal(k_d, (n, input_size), jnp.float32)

    out = fusion_forward(params, hidden, dy_emb)
    out = jax.block_until_ready(out)

    assert out.shape == (n, input_size), out.shape
    assert out.dtype == jnp.float32
    assert bool(jnp.all(jnp.isfinite(out)))

    expected = _reference(params, hidden, dy_emb)
    max_err = float(jnp.max(jnp.abs(out - expected)))
    # bf16 MXU operands vs f32 reference -> small, bounded deviation.
    assert max_err < 1e-1, max_err

    print("KERNEL_OK")
</pallas_src>

<mosaic_0001>
module attributes {stable_mosaic.version = 11 : i64} {
  func.func @_fusion_kernel(%arg0: i32, %arg1: memref<128x128xf32, #tpu.memory_space<vmem>>, %arg2: memref<128x128xf32, #tpu.memory_space<vmem>>, %arg3: memref<128x128xbf16, #tpu.memory_space<vmem>>, %arg4: memref<1x128xf32, #tpu.memory_space<vmem>>, %arg5: memref<1x128xf32, #tpu.memory_space<vmem>>, %arg6: memref<128x128xf32, #tpu.memory_space<vmem>>) attributes {dimension_semantics = [#tpu.dimension_semantics<parallel>], iteration_bounds = array<i64: 2>, scalar_prefetch = 0 : i64, scratch_operands = 0 : i64, tpu.core_type = #tpu.core_type<tc>, window_params = [{transform_indices = @transform_0, window_bounds = array<i64: 128, 128>}, {transform_indices = @transform_1, window_bounds = array<i64: 128, 128>}, {pipeline_mode = #tpu.pipeline_mode<synchronous>, transform_indices = @transform_2, window_bounds = array<i64: 128, 128>}, {pipeline_mode = #tpu.pipeline_mode<synchronous>, transform_indices = @transform_3, window_bounds = array<i64: 1, 128>}, {pipeline_mode = #tpu.pipeline_mode<synchronous>, transform_indices = @transform_4, window_bounds = array<i64: 1, 128>}, {transform_indices = @transform_5, window_bounds = array<i64: 128, 128>}]} {
    %c0 = arith.constant 0 : index
    %c0_0 = arith.constant 0 : index
    %0 = vector.load %arg1[%c0, %c0_0] : memref<128x128xf32, #tpu.memory_space<vmem>>, vector<128x128xf32>
    %c0_1 = arith.constant 0 : index
    %c0_2 = arith.constant 0 : index
    %1 = vector.load %arg2[%c0_1, %c0_2] : memref<128x128xf32, #tpu.memory_space<vmem>>, vector<128x128xf32>
    %c0_3 = arith.constant 0 : index
    %c0_4 = arith.constant 0 : index
    %2 = vector.load %arg4[%c0_3, %c0_4] : memref<1x128xf32, #tpu.memory_space<vmem>>, vector<1x128xf32>
    %c0_5 = arith.constant 0 : index
    %c0_6 = arith.constant 0 : index
    %3 = vector.load %arg5[%c0_5, %c0_6] : memref<1x128xf32, #tpu.memory_space<vmem>>, vector<1x128xf32>
    %4 = tpu.concatenate %0, %1 in 0 : vector<128x128xf32>, vector<128x128xf32> -> vector<256x128xf32>
    %5 = arith.truncf %4 : vector<256x128xf32> to vector<256x128xbf16>
    %c0_7 = arith.constant 0 : index
    %c0_8 = arith.constant 0 : index
    %6 = vector.load %arg3[%c0_7, %c0_8] : memref<128x128xbf16, #tpu.memory_space<vmem>>, vector<128x128xbf16>
    %cst = arith.constant dense<0.000000e+00> : vector<256x128xf32>
    %7 = tpu.matmul %5, %6, %cst {dimension_numbers = #tpu.dot_dimension_numbers<[1], [0], [0], [1], [0, 0, 1, 1], [], []>} : vector<256x128xbf16>, vector<128x128xbf16>, vector<256x128xf32> -> vector<256x128xf32>
    %8 = vector.broadcast %2 : vector<1x128xf32> to vector<256x128xf32>
    %9 = arith.addf %7, %8 : vector<256x128xf32>
    %10 = math.tanh %9 : vector<256x128xf32>
    %11 = vector.broadcast %3 : vector<1x128xf32> to vector<256x128xf32>
    %12 = arith.mulf %10, %11 : vector<256x128xf32>
    %cst_9 = arith.constant dense<0.000000e+00> : vector<256xf32>
    %13 = vector.multi_reduction <add>, %12, %cst_9 [1] : vector<256x128xf32> to vector<256xf32>
    %14 = vector.shape_cast %13 : vector<256xf32> to vector<256x1xf32>
    %15 = vector.extract_strided_slice %14 {offsets = [0, 0], sizes = [128, 1], strides = [1, 1]} : vector<256x1xf32> to vector<128x1xf32>
    %16 = vector.extract_strided_slice %14 {offsets = [128, 0], sizes = [128, 1], strides = [1, 1]} : vector<256x1xf32> to vector<128x1xf32>
    %17 = arith.subf %15, %16 : vector<128x1xf32>
    %18 = arith.negf %17 : vector<128x1xf32>
    %19 = math.exp %18 : vector<128x1xf32>
    %cst_10 = arith.constant 1.000000e+00 : f32
    %20 = vector.broadcast %cst_10 : f32 to vector<128x1xf32>
    %21 = arith.addf %20, %19 : vector<128x1xf32>
    %22 = arith.divf %20, %21 : vector<128x1xf32>
    %23 = vector.broadcast %22 : vector<128x1xf32> to vector<128x128xf32>
    %24 = arith.mulf %23, %0 : vector<128x128xf32>
    %cst_11 = arith.constant 1.000000e+00 : f32
    %25 = vector.broadcast %cst_11 : f32 to vector<128x1xf32>
    %26 = arith.subf %25, %22 : vector<128x1xf32>
    %27 = vector.broadcast %26 : vector<128x1xf32> to vector<128x128xf32>
    %28 = arith.mulf %27, %1 : vector<128x128xf32>
    %29 = arith.addf %24, %28 : vector<128x128xf32>
    %c0_12 = arith.constant 0 : index
    %c0_13 = arith.constant 0 : index
    %30 = vector.load %arg6[%c0_12, %c0_13] : memref<128x128xf32, #tpu.memory_space<vmem>>, vector<128x128xf32>
    tpu.vector_store %arg6[%c0_12, %c0_13], %29 {strides = array<i32>} : memref<128x128xf32, #tpu.memory_space<vmem>>, vector<128x128xf32>,
    return
  }
  func.func @transform_0(%arg0: i32) -> (i32, i32) {
    %c0_i32 = arith.constant 0 : i32
    %c0_i32_0 = arith.constant 0 : i32
    return %arg0, %c0_i32 : i32, i32
  }
  func.func @transform_1(%arg0: i32) -> (i32, i32) {
    %c0_i32 = arith.constant 0 : i32
    %c0_i32_0 = arith.constant 0 : i32
    return %arg0, %c0_i32 : i32, i32
  }
  func.func @transform_2(%arg0: i32) -> (i32, i32) {
    %c0_i32 = arith.constant 0 : i32
    %c0_i32_0 = arith.constant 0 : i32
    %c0_i32_1 = arith.constant 0 : i32
    return %c0_i32, %c0_i32_0 : i32, i32
  }
  func.func @transform_3(%arg0: i32) -> (i32, i32) {
    %c0_i32 = arith.constant 0 : i32
    %c0_i32_0 = arith.constant 0 : i32
    %c0_i32_1 = arith.constant 0 : i32
    return %c0_i32, %c0_i32_0 : i32, i32
  }
  func.func @transform_4(%arg0: i32) -> (i32, i32) {
    %c0_i32 = arith.constant 0 : i32
    %c0_i32_0 = arith.constant 0 : i32
    %c0_i32_1 = arith.constant 0 : i32
    return %c0_i32, %c0_i32_0 : i32, i32
  }
  func.func @transform_5(%arg0: i32) -> (i32, i32) {
    %c0_i32 = arith.constant 0 : i32
    %c0_i32_0 = arith.constant 0 : i32
    return %arg0, %c0_i32 : i32, i32
  }
}

</mosaic_0001>

<bundles_post_ra>
// kernel: tpu_custom_call.1
= control target key start
LH: loop header
LB: loop body
LE: loop exit
PB: predicated region body
PF: predicated region fallthrough
CT: control target
= control target key end

     0   :  { %s2228_s0 = inlined_call_operand.hbm [shape: f32[256,128], index: 0, kind: input, shape index: {}]   ;;  %s2229_s1 = inlined_call_operand.hbm [shape: f32[256,128], index: 1, kind: input, shape index: {}]   ;;  %s2230_s2 = inlined_call_operand.hbm [shape: bf16[128,128], index: 2, kind: input, shape index: {}]   ;;  %s2231_s3 = inlined_call_operand.vmem [shape: f32[1,128], index: 3, kind: input, shape index: {}]   ;;  %s2232_s4 = inlined_call_operand.vmem [shape: f32[1,128], index: 4, kind: input, shape index: {}]   ;;  %s2233_s5 = inlined_call_operand.hbm [shape: f32[256,128], index: 5, kind: output, shape index: {}]  }
   0x1   :  { %2235 = sst [smem:[#allocation15_spill]] %s2228_s0 }
   0x2   :  { %2236 = sst [smem:[#allocation16_spill]] %s2230_s2 }
   0x3   :  { %10 = vsyncpa [#allocation3], 0 }
   0x4   :  { %12 = vsyncpa [#allocation3 + $0x1], 0 }
   0x5   :  { %13 = vsyncpa [#allocation6], 0 }
   0x6   :  { %15 = vsyncpa [#allocation6 + $0x1], 0 }
   0x7   :  { %16 = vsyncpa [#allocation4], 0 }
   0x8   :  { %18 = vsyncpa [#allocation4 + $0x1], 0  ;;  %s1684_s18 = smov 0   ;;  %s1686_s19 = smov 0  }
   0x9   :  { %s1688_s20 = smov 0   ;;  %s1690_s21 = smov 0  }
   0xa LB: > { %2237 = sst [smem:[#allocation13_spill]] %s1641_s20  ;;  %s1705_s22 = sadd.s32 4294967295, %s1645_s21   ;;  %s1645_s21 = sphi %s1690_s21, %s2267_s21   ;;  %s1641_s20 = sphi %s1688_s20, %s2264_s20   ;;  %s1637_s19 = sphi %s1686_s19, %s2266_s19   ;;  %s1633_s18 = sphi %s1684_s18, %s2265_s18  }
   0xb   : > { %s1164_s23 = sadd.s32 4294967294, %s1645_s21   ;;  %p44_p0 = scmp.ne.s32.totalorder %s1637_s19, %s1633_s18 }
   0xc   : > { %p45_p1 = scmp.eq.s32.totalorder %s1705_s22, 0  ;;  %p157_p2 = scmp.eq.s32.totalorder %s1705_s22, 1 }
   0xd   : > { %p163_p3 = scmp.eq.s32.totalorder %s1164_s23, 1  ;;  %p1165_p5 = scmp.ge.s32.totalorder %s1645_s21, 1 }
   0xe   : > { %p1714_p4 = por %p45_p1, %p44_p0  ;;  %p170_p7 = scmp.lt.s32.totalorder %s1645_s21, 3 }
   0xf   : > { %p1719_p6 = por %p163_p3, %p44_p0  ;;  %s2240_s2 = sld [smem:[#allocation16_spill]] }
  0x10   : > { %p1727_p8 = pnand %p1165_p5, %p170_p7  ;;  %s1647_s30 = smov [#allocation7]  }
  0x11   : > { %s183_s6 = sshll.u32 %s1647_s30, 4  ;;  %s1737_s7 = sadd.s32 1, %s1645_s21   ;;  %s184_s6 = int_to_ptr.vmem [resolvable:$true] %s183_s6 }
  0x12   : > { %p1277_p9 = pneg %p1727_p8  ;;  %s1648_s8 = smov 64  }
  0x13   : > { %s1649_s9 = smov 4   ;;  %s28_s10 = ssub.s32 %s1645_s21, %s1737_s7 }
  0x14   : > { %p1278_p10 = pnand %p1277_p9, %p45_p1  ;;  %s31_s11 = sadd.s32 1, %s1641_s20 }
  0x15   : > { %s181_s28 = sshll.u32 %s2240_s2, 4  ;;  %p29_p12 = scmp.eq.s32.totalorder %s28_s10, 0  ;;  %s182_s28 = int_to_ptr.hbm [resolvable:$true] %s181_s28 }
  0x16   : > { %1280 = dma.hbm_to_vmem [thread:$0]  (!%p1278_p10), %s182_s28, 1024, %s184_s6, [#allocation6], %s1648_s8, %s1648_s8, %s1649_s9  }
  0x17   : > { %p38_p13 = scmp.ne.s32.totalorder %s1641_s20, %s1637_s19  ;;  %p39_p0 = scmp.eq.s32.totalorder %s1645_s21, 0 }
  0x18   : > { %p1293_p3 = scmp.lt.s32.totalorder %s1645_s21, 2  ;;  %s203_s14 = sand.u32 1, %s1641_s20  }
  0x19   : > { %s1747_s12 = scalar_select %p29_p12, %s1641_s20, %s31_s11  }
  0x1a   : > { %p40_p5 = por %p39_p0, %p38_p13  ;;  %p1751_p7 = por %p157_p2, %p38_p13 }
  0x1b   : > { %2242 = sst [smem:[#allocation14_spill]] %s1747_s12  ;;  %s1232_s15 = sshll.u32 %s1645_s21, 7 }
  0x1c   : > { %s1757_s16 = sshll.u32 %s203_s14, 7  ;;  %s2244_s0 = sld [smem:[#allocation15_spill]] }
  0x1d   : > { %s207_s28 = scalar_lea.vmem [#allocation2], %s1757_s16  ;;  %p1765_p9 = pnand %p1293_p3, %p40_p5 }
  0x1e   : > { %s215_s30 = sshll.u32 %s207_s28, 4  ;;  %s234_s10 = scalar_lea.hbm %s2229_s1, %s1232_s15  ;;  %s216_s30 = int_to_ptr.vmem [resolvable:$true] %s215_s30 }
  0x1f   : > { %s204_s11 = scalar_lea.sflag [#allocation3], %s203_s14  ;;  %p1515_p10 = pneg %p1765_p9 }
  0x22   : > { %s212_s26 = scalar_lea.hbm %s2244_s0, %s1232_s15  ;;  %s1518_s2 = scalar_lea.hbm %s2244_s0, 256 }
  0x23   : > { %s213_s27 = sshll.u32 %s212_s26, 4  ;;  %s214_s27 = int_to_ptr.hbm [resolvable:$true] %s213_s27 }
  0x24   : > { %s1511_s17 = sshra.s32 %s214_s27, 4  ;;  %s1512_s17 = int_to_ptr.hbm [resolvable:$true] %s1511_s17 }
  0x25   : > { %s1513_s23 = scalar_lea.hbm %s1512_s17, 128  ;;  %p1519_p0 = scmp.lt.s32.totalorder %s1512_s17, %s2244_s0 }
  0x26   : > { %p1514_p2 = scmp.ne.s32.totalorder %s1512_s17, %s1513_s23  ;;  %p1520_p3 = scmp.lt.s32.totalorder %s1518_s2, %s1513_s23 }
  0x28   : > { %p1516_p12 = pnand %p1515_p10, %p1514_p2  ;;  %p1521_p5 = por %p1520_p3, %p1519_p0 }
  0x2a   : > { %p1517_p13 = pneg %p1516_p12 }
  0x2c   : > { %p1522_p11 = pnand %p1521_p5, %p1517_p13 }
  0x2e   : > { %1525 = shalt.err (!%p1522_p11)
}
  0x2f   : > { %s1650_s14 = smov 128   ;;  %s1651_s15 = smov 8  }
  0x30   : > { %1284 = dma.hbm_to_vmem [thread:$0]  (!%p1765_p9), %s214_s27, 2048, %s216_s30, %s204_s11, %s1650_s14, %s1650_s14, %s1651_s15  }
  0x31   : > { %s235_s9 = sshll.u32 %s234_s10, 4  ;;  %s229_s20 = scalar_lea.vmem [#allocation5], %s1757_s16  ;;  %s236_s9 = int_to_ptr.hbm [resolvable:$true] %s235_s9 }
  0x32   : > { %s237_s26 = sshll.u32 %s229_s20, 4  ;;  %s225_s28 = sand.u32 1, %s1645_s21   ;;  %s238_s26 = int_to_ptr.vmem [resolvable:$true] %s237_s26 }
  0x33   : > { %s226_s12 = scalar_lea.sflag [#allocation6], %s225_s28  ;;  %s1541_s17 = sshra.s32 %s236_s9, 4  ;;  %s1542_s17 = int_to_ptr.hbm [resolvable:$true] %s1541_s17 }
  0x34   : > { %s1543_s2 = scalar_lea.hbm %s1542_s17, 128  ;;  %s1548_s0 = scalar_lea.hbm %s2229_s1, 256 }
  0x35   : > { %p1544_p2 = scmp.ne.s32.totalorder %s1542_s17, %s1543_s2  ;;  %p1549_p13 = scmp.lt.s32.totalorder %s1542_s17, %s2229_s1 }
  0x36   : > { %p1550_p0 = scmp.lt.s32.totalorder %s1548_s0, %s1543_s2 }
  0x37   : > { %p1546_p11 = pnand %p1544_p2, %p1515_p10 }
  0x38   : > { %p1551_p3 = por %p1550_p0, %p1549_p13 }
  0x39   : > { %p1547_p12 = pneg %p1546_p11 }
  0x3b   : > { %p1552_p5 = pnand %p1551_p3, %p1547_p12 }
  0x3d   : > { %1555 = shalt.err (!%p1552_p5)
}
  0x3e   : > { %1287 = dma.hbm_to_vmem [thread:$0]  (!%p1765_p9), %s236_s9, 2048, %s238_s26, %s226_s12, %s1650_s14, %s1650_s14, %s1651_s15  }
  0x3f   : > { %249 = sbr.rel (%p1727_p8) target bundleno = 486 (0x1e6), region = 40  ;;  %s1801_s20 = sand.u32 (!%p1727_p8), 1, %s1637_s19  }
  0x40   : > { %s1804_s16 = sshll.u32 (!%p1727_p8), %s1801_s20, 7  ;;  %s252_s10 = scalar_lea.sflag (!%p1727_p8), [#allocation3], %s1801_s20 }
  0x41   : > { %s1808_s0 = scalar_lea.vmem (!%p1727_p8), [#allocation2], %s1804_s16 }
  0x44   : > { %1616 = dma.done.wait (%p1714_p4), %s252_s10, 2048  }
  0x45   : > { %1618 = vsyncadd (%p1714_p4), %s252_s10, 4294965248  ;;  %s261_s29 = sand.u32 1, %s1705_s22   ;;  %s1816_s11 = scalar_lea.vmem [#allocation5], %s1804_s16 }
  0x46   : > { %s262_s6 = scalar_lea.sflag [#allocation6], %s261_s29 }
  0x47   : > { %1620 = dma.done.wait (%p1714_p4), %s262_s6, 2048  }
  0x48   : > { %1622 = vsyncadd (%p1714_p4), %s262_s6, 4294965248 }
  0x49   : > { %1624 = dma.done.wait (%p45_p1), [#allocation6], 1024  }
  0x4a   : > { %1626 = vsyncadd (%p45_p1), [#allocation6], 4294966272  ;;  %v1241_v0 = vld [vmem:[#allocation7 + $0x38] sm:$0xff]  ;;  %v1240_v1 = vld [vmem:[#allocation7 + $0x30] sm:$0xff]  ;;  %s1994_s26 = scalar_lea.vmem [#allocation8], %s1804_s16  ;;  %s1242_s28 = sshll.u32 %s1705_s22, 7 }
  0x4b   : > { %423 = vmatpush.bf16.msra.mxu0 %v1241_v0  ;;  %1244 = vmatpush.bf16.msra.mxu2 %v1241_v0  ;;  %v1239_v2 = vld [vmem:[#allocation7 + $0x28] sm:$0xff]  ;;  %v1238_v3 = vld [vmem:[#allocation7 + $0x20] sm:$0xff]  ;;  %v1237_v4 = vld [vmem:[#allocation7 + $0x18] sm:$0xff]  ;;  %s1055_s17 = scalar_lea.hbm %s2233_s5, %s1242_s28  ;;  %s1056_s2 = sshll.u32 %s1994_s26, 4  ;;  %s1057_s2 = int_to_ptr.vmem [resolvable:$true] %s1056_s2 }
  0x4c   : > { %1245 = vmatpush.bf16.msra.mxu3 %v1241_v0  ;;  %1243 = vmatpush.bf16.msra.mxu1 %v1241_v0  ;;  %v1236_v5 = vld [vmem:[#allocation7 + $0x10] sm:$0xff]  ;;  %v1235_v6 = vld [vmem:[#allocation7 + $0x8] sm:$0xff]  ;;  %v1234_v7 = vld [vmem:[#allocation7] sm:$0xff]  ;;  %s1058_s23 = sshll.u32 %s1055_s17, 4  ;;  %s1044_s8 = scalar_lea.sflag [#allocation4], %s1801_s20  ;;  %s1059_s23 = int_to_ptr.hbm [resolvable:$true] %s1058_s23 }
  0x4d   : > { %v1827_v8 = vld [vmem:[%s1808_s0] sm:$0xff]  ;;  %v1830_v9 = vld [vmem:[%s1808_s0 + $0x8] sm:$0xff]  ;;  %v1859_v20 = vld [vmem:[%s1808_s0 + $0x10] sm:$0xff]  ;;  %s1585_s27 = sshra.s32 %s1059_s23, 4  ;;  %s1591_s29 = scalar_lea.hbm %s2233_s5, 256  ;;  %s1586_s27 = int_to_ptr.hbm [resolvable:$true] %s1585_s27 }
  0x4e   : > { %v1833_v10 = vld [vmem:[%s1816_s11] sm:$0xff]  ;;  %v1836_v11 = vld [vmem:[%s1816_s11 + $0x8] sm:$0xff]  ;;  %v340_v16 = vpack.c.bf16 %v1830_v9, %v1827_v8  ;;  %v309_v21 = vld [vmem:[%s1808_s0 + $0x18] sm:$0xff]  ;;  %s1587_s30 = scalar_lea.hbm %s1586_s27, 128  ;;  %p1592_p9 = scmp.lt.s32.totalorder %s1586_s27, %s2233_s5 }
  0x4f   : > { %424 = vmatpush.bf16.msra.mxu0 %v1240_v1  ;;  %1247 = vmatpush.bf16.msra.mxu2 %v1240_v1  ;;  %v1839_v12 = vld [vmem:[%s1816_s11 + $0x40] sm:$0xff]  ;;  %v1842_v13 = vld [vmem:[%s1816_s11 + $0x48] sm:$0xff]  ;;  %v348_v17 = vpack.c.bf16 %v1836_v11, %v1833_v10  ;;  %v1863_v22 = vld [vmem:[%s1816_s11 + $0x50] sm:$0xff]  ;;  %v341_v28 = vpack.c.bf16 %v309_v21, %v1859_v20  ;;  %p1588_p1 = scmp.ne.s32.totalorder %s1586_s27, %s1587_s30  ;;  %p1593_p10 = scmp.lt.s32.totalorder %s1591_s29, %s1587_s30 }
  0x50   : > { %1248 = vmatpush.bf16.msra.mxu3 %v1240_v1  ;;  %1246 = vmatpush.bf16.msra.mxu1 %v1240_v1  ;;  %v1845_v14 = vld [vmem:[%s1808_s0 + $0x40] sm:$0xff]  ;;  %v1848_v15 = vld [vmem:[%s1808_s0 + $0x48] sm:$0xff]  ;;  %v352_v18 = vpack.c.bf16 %v1842_v13, %v1839_v12  ;;  %v1866_v23 = vld [vmem:[%s1816_s11 + $0x10] sm:$0xff] }
  0x51   : > { %v344_v19 = vpack.c.bf16 %v1848_v15, %v1845_v14  ;;  %v325_v24 = vld [vmem:[%s1816_s11 + $0x18] sm:$0xff]  ;;  %v1873_v26 = vld [vmem:[%s1808_s0 + $0x50] sm:$0xff]  ;;  %v1885_v32 = vld [vmem:[%s1808_s0 + $0x20] sm:$0xff]  ;;  %p1589_p4 = pnand %p1588_p1, %p1751_p7  ;;  %p1594_p2 = por %p1593_p10, %p1592_p9 }
  0x52   : > { %v1870_v25 = vld [vmem:[%s1816_s11 + $0x58] sm:$0xff]  ;;  %v349_v29 = vpack.c.bf16 %v325_v24, %v1866_v23  ;;  %v311_v33 = vld [vmem:[%s1808_s0 + $0x28] sm:$0xff]  ;;  %v1889_v34 = vld [vmem:[%s1816_s11 + $0x20] sm:$0xff] }
  0x53   : > { %425 = vmatpush.bf16.msra.mxu0 %v1239_v2  ;;  %1250 = vmatpush.bf16.msra.mxu2 %v1239_v2  ;;  %v1876_v27 = vld [vmem:[%s1808_s0 + $0x58] sm:$0xff]  ;;  %v353_v30 = vpack.c.bf16 %v1870_v25, %v1863_v22  ;;  %v327_v35 = vld [vmem:[%s1816_s11 + $0x28] sm:$0xff]  ;;  %v334_v36 = vld [vmem:[%s1816_s11 + $0x60] sm:$0xff]  ;;  %v342_v40 = vpack.c.bf16 %v311_v33, %v1885_v32  ;;  %p1590_p8 = pneg %p1589_p4 }
  0x54   : > { %1251 = vmatpush.bf16.msra.mxu3 %v1239_v2  ;;  %1249 = vmatpush.bf16.msra.mxu1 %v1239_v2  ;;  %v345_v31 = vpack.c.bf16 %v1876_v27, %v1873_v26  ;;  %v335_v37 = vld [vmem:[%s1816_s11 + $0x68] sm:$0xff]  ;;  %v318_v38 = vld [vmem:[%s1808_s0 + $0x60] sm:$0xff]  ;;  %v350_v41 = vpack.c.bf16 %v327_v35, %v1889_v34  ;;  %v328_v44 = vld [vmem:[%s1816_s11 + $0x30] sm:$0xff] }
  0x55   : > { %v319_v39 = vld [vmem:[%s1808_s0 + $0x68] sm:$0xff]  ;;  %v354_v42 = vpack.c.bf16 %v335_v37, %v334_v36  ;;  %v329_v45 = vld [vmem:[%s1816_s11 + $0x38] sm:$0xff]  ;;  %v312_v46 = vld [vmem:[%s1808_s0 + $0x30] sm:$0xff]  ;;  %p1595_p11 = pnand %p1594_p2, %p1590_p8 }
  0x56   : > { %v346_v43 = vpack.c.bf16 %v319_v39, %v318_v38  ;;  %v313_v47 = vld [vmem:[%s1808_s0 + $0x38] sm:$0xff]  ;;  %v320_v48 = vld [vmem:[%s1808_s0 + $0x70] sm:$0xff]  ;;  %v351_v52 = vpack.c.bf16 %v329_v45, %v328_v44  ;;  %v1909_v56 = vld [vmem:[%s2231_s3] ss:$0 sm:$0xff] }
  0x57   : > { %426 = vmatpush.bf16.msra.mxu0 %v1238_v3  ;;  %1253 = vmatpush.bf16.msra.mxu2 %v1238_v3  ;;  %v321_v49 = vld [vmem:[%s1808_s0 + $0x78] sm:$0xff]  ;;  %v336_v50 = vld [vmem:[%s1816_s11 + $0x70] sm:$0xff]  ;;  %v343_v53 = vpack.c.bf16 %v313_v47, %v312_v46  ;;  %v1916_v62 = vld [vmem:[%s2232_s4] ss:$0 sm:$0xff] }
  0x58   : > { %1254 = vmatpush.bf16.msra.mxu3 %v1238_v3  ;;  %1252 = vmatpush.bf16.msra.mxu1 %v1238_v3  ;;  %v337_v51 = vld [vmem:[%s1816_s11 + $0x78] sm:$0xff]  ;;  %v347_v54 = vpack.c.bf16 %v321_v49, %v320_v48 }
  0x59   : > { %v355_v55 = vpack.c.bf16 %v337_v51, %v336_v50 }
  0x5b   : > { %427 = vmatpush.bf16.msra.mxu0 %v1237_v4  ;;  %1256 = vmatpush.bf16.msra.mxu2 %v1237_v4 }
  0x5c   : > { %1257 = vmatpush.bf16.msra.mxu3 %v1237_v4  ;;  %1255 = vmatpush.bf16.msra.mxu1 %v1237_v4 }
  0x5f   : > { %428 = vmatpush.bf16.msra.mxu0 %v1236_v5  ;;  %1259 = vmatpush.bf16.msra.mxu2 %v1236_v5 }
  0x60   : > { %1260 = vmatpush.bf16.msra.mxu3 %v1236_v5  ;;  %1258 = vmatpush.bf16.msra.mxu1 %v1236_v5 }
  0x63   : > { %429 = vmatpush.bf16.msra.mxu0 %v1235_v6  ;;  %1262 = vmatpush.bf16.msra.mxu2 %v1235_v6 }
  0x64   : > { %1263 = vmatpush.bf16.msra.mxu3 %v1235_v6  ;;  %1261 = vmatpush.bf16.msra.mxu1 %v1235_v6 }
  0x67   : > { %430 = vmatpush.bf16.msra.mxu0 %v1234_v7  ;;  %1265 = vmatpush.bf16.msra.mxu2 %v1234_v7 }
  0x68   : > { %1266 = vmatpush.bf16.msra.mxu3 %v1234_v7  ;;  %1264 = vmatpush.bf16.msra.mxu1 %v1234_v7 }
  0x6a   : > { %431 = vmatmul.bf16.vlgmr.msra.gmra.mxu0 %v340_v16  ;;  %471 = vmatmul.bf16.vlgmr.msra.gmra.mxu2 %v348_v17 }
  0x6b   : > { %491 = vmatmul.bf16.vlgmr.msra.gmra.mxu3 %v352_v18  ;;  %451 = vmatmul.bf16.vlgmr.msra.gmra.mxu1 %v344_v19 }
  0x7a   : > { %436 = vmatmul.bf16.gmra.mxu0 %v341_v28  ;;  %476 = vmatmul.bf16.gmra.mxu2 %v349_v29 }
  0x7b   : > { %496 = vmatmul.bf16.gmra.mxu3 %v353_v30  ;;  %456 = vmatmul.bf16.gmra.mxu1 %v345_v31 }
  0x8a   : > { %441 = vmatmul.bf16.gmra.mxu0 %v342_v40  ;;  %481 = vmatmul.bf16.gmra.mxu2 %v350_v41 }
  0x8b   : > { %501 = vmatmul.bf16.gmra.mxu3 %v354_v42  ;;  %461 = vmatmul.bf16.gmra.mxu1 %v346_v43 }
  0x9a   : > { %486 = vmatmul.bf16.gmra.mxu2 %v351_v52  ;;  %446 = vmatmul.bf16.gmra.mxu0 %v343_v53 }
  0x9b   : > { %466 = vmatmul.bf16.gmra.mxu1 %v347_v54  ;;  %506 = vmatmul.bf16.gmra.mxu3 %v355_v55 }
  0xe7   : > { %v432_v57 = vpop.f32.mrf.mxu0 }
  0xe8   : > { %v433_v58 = vadd.f32 %v1909_v56, %v432_v57  ;;  %v452_v59 = vpop.f32.mrf.mxu1 }
  0xe9   : > { %v453_v60 = vadd.f32 %v1909_v56, %v452_v59 }
  0xea   : > { %1337 = vtanh.f32 %v433_v58 }
  0xeb   : > { %1339 = vtanh.f32 %v453_v60 }
  0xed   : > { %v472_v61 = vpop.f32.mrf.mxu2 }
  0xee   : > { %v473_v63 = vadd.f32 %v1909_v56, %v472_v61  ;;  %v492_v0 = vpop.f32.mrf.mxu3 }
  0xef   : > { %v493_v1 = vadd.f32 %v1909_v56, %v492_v0  ;;  %v434_v2 = vpop.f32.mrf.mxu0 }
  0xf0   : > { %v1338_v3 = vpop.eup %1337  ;;  %1341 = vtanh.f32 %v473_v63  ;;  %v454_v4 = vpop.f32.mrf.mxu1  ;;  %v435_v16 = vadd.f32 %v1909_v56, %v434_v2 }
  0xf1   : > { %v1340_v5 = vpop.eup %1339  ;;  %1343 = vtanh.f32 %v493_v1  ;;  %v547_v6 = vmul.f32 %v1338_v3, %v1916_v62  ;;  %v455_v36 = vadd.f32 %v1909_v56, %v454_v4 }
  0xf2   : > { %v555_v7 = vmul.f32 %v1340_v5, %v1916_v62  ;;  %1345 = vtanh.f32 %v435_v16 }
  0xf3   : > { %579 = vadd.xlane.f32.xlu0 %v547_v6 }
  0xf4   : > { %595 = vadd.xlane.f32.xlu2 %v555_v7 }
  0xf5   : > { %v474_v17 = vpop.f32.mrf.mxu2 }
  0xf6   : > { %v1342_v18 = vpop.eup %1341  ;;  %v475_v19 = vadd.f32 %v1909_v56, %v474_v17  ;;  %v494_v21 = vpop.f32.mrf.mxu3 }
  0xf7   : > { %v1344_v24 = vpop.eup %1343  ;;  %v495_v28 = vadd.f32 %v1909_v56, %v494_v21  ;;  %v437_v29 = vpop.f32.mrf.mxu0  ;;  %v563_v30 = vmul.f32 %v1342_v18, %v1916_v62 }
  0xf8   : > { %1347 = vtanh.f32 %v475_v19  ;;  %v457_v31 = vpop.f32.mrf.mxu1  ;;  %v438_v33 = vadd.f32 %v1909_v56, %v437_v29  ;;  %v571_v35 = vmul.f32 %v1344_v24, %v1916_v62  ;;  %v1346_v37 = vpop.eup %1345 }
  0xf9   : > { %1349 = vtanh.f32 %v495_v28  ;;  %611 = vadd.xlane.f32.xlu1 %v563_v30  ;;  %v458_v45 = vadd.f32 %v1909_v56, %v457_v31  ;;  %v548_v48 = vmul.f32 %v1346_v37, %v1916_v62 }
  0xfa   : > { %1351 = vtanh.f32 %v438_v33 }
  0xfb   : > { %627 = vadd.xlane.f32.xlu0 %v571_v35  ;;  %1353 = vtanh.f32 %v455_v36 }
  0xfd   : > { %v477_v38 = vpop.f32.mrf.mxu2 }
  0xfe   : > { %v1348_v39 = vpop.eup %1347  ;;  %v497_v40 = vpop.f32.mrf.mxu3  ;;  %v478_v50 = vadd.f32 %v1909_v56, %v477_v38 }
  0xff   : > { %v1350_v41 = vpop.eup %1349  ;;  %v498_v42 = vadd.f32 %v1909_v56, %v497_v40  ;;  %v439_v43 = vpop.f32.mrf.mxu0  ;;  %v564_v44 = vmul.f32 %v1348_v39, %v1916_v62 }
 0x100   : > { %v572_v46 = vmul.f32 %v1350_v41, %v1916_v62  ;;  %v459_v47 = vpop.f32.mrf.mxu1  ;;  %v1352_v51 = vpop.eup %1351  ;;  %v440_v2 = vadd.f32 %v1909_v56, %v439_v43 }
 0x101   : > { %1355 = vtanh.f32 %v498_v42  ;;  %613 = vadd.xlane.f32.xlu2 %v564_v44  ;;  %v460_v49 = vadd.f32 %v1909_v56, %v459_v47  ;;  %v1354_v53 = vpop.eup %1353  ;;  %v549_v55 = vmul.f32 %v1352_v51, %v1916_v62 }
 0x102   : > { %629 = vadd.xlane.f32.xlu1 %v572_v46  ;;  %1357 = vtanh.f32 %v458_v45  ;;  %v556_v61 = vmul.f32 %v1354_v53, %v1916_v62 }
 0x103   : > { %581 = vadd.xlane.f32.xlu0 %v548_v48  ;;  %1359 = vtanh.f32 %v460_v49 }
 0x104   : > { %1361 = vtanh.f32 %v478_v50 }
 0x105   : > { %v479_v52 = vpop.f32.mrf.mxu2 }
 0x106   : > { %v499_v54 = vpop.f32.mrf.mxu3  ;;  %v480_v30 = vadd.f32 %v1909_v56, %v479_v52 }
 0x107   : > { %v1356_v57 = vpop.eup %1355  ;;  %v442_v58 = vpop.f32.mrf.mxu0  ;;  %v500_v4 = vadd.f32 %v1909_v56, %v499_v54 }
 0x108   : > { %v573_v59 = vmul.f32 %v1356_v57, %v1916_v62  ;;  %v462_v60 = vpop.f32.mrf.mxu1  ;;  %v443_v63 = vadd.f32 %v1909_v56, %v442_v58  ;;  %v1358_v0 = vpop.eup %1357 }
 0x109   : > { %v1360_v1 = vpop.eup %1359  ;;  %v557_v7 = vmul.f32 %v1358_v0, %v1916_v62  ;;  %v463_v28 = vadd.f32 %v1909_v56, %v462_v60 }
 0x10a   : > { %631 = vadd.xlane.f32.xlu2 %v573_v59  ;;  %583 = vadd.xlane.f32.xlu1 %v549_v55  ;;  %v1362_v3 = vpop.eup %1361  ;;  %1363 = vtanh.f32 %v443_v63  ;;  %v558_v6 = vmul.f32 %v1360_v1, %v1916_v62 }
 0x10b   : > { %597 = vadd.xlane.f32.xlu0 %v556_v61  ;;  %1365 = vtanh.f32 %v440_v2  ;;  %v565_v17 = vmul.f32 %v1362_v3, %v1916_v62 }
 0x10c   : > { %1367 = vtanh.f32 %v500_v4 }
 0x10d   : > { %v482_v5 = vpop.f32.mrf.mxu2 }
 0x10e   : > { %v502_v16 = vpop.f32.mrf.mxu3  ;;  %v483_v21 = vadd.f32 %v1909_v56, %v482_v5 }
 0x10f   : > { %v444_v18 = vpop.f32.mrf.mxu0  ;;  %v503_v44 = vadd.f32 %v1909_v56, %v502_v16 }
 0x110   : > { %v464_v19 = vpop.f32.mrf.mxu1  ;;  %v1364_v29 = vpop.eup %1363  ;;  %v445_v47 = vadd.f32 %v1909_v56, %v444_v18 }
 0x111   : > { %v465_v24 = vadd.f32 %v1909_v56, %v464_v19  ;;  %v1366_v31 = vpop.eup %1365  ;;  %v551_v36 = vmul.f32 %v1364_v29, %v1916_v62 }
 0x112   : > { %601 = vadd.xlane.f32.xlu2 %v558_v6  ;;  %599 = vadd.xlane.f32.xlu1 %v557_v7  ;;  %v1368_v35 = vpop.eup %1367  ;;  %v550_v40 = vmul.f32 %v1366_v31, %v1916_v62 }
 0x113   : > { %615 = vadd.xlane.f32.xlu0 %v565_v17  ;;  %1369 = vtanh.f32 %v465_v24  ;;  %v574_v45 = vmul.f32 %v1368_v35, %v1916_v62 }
 0x114   : > { %1371 = vtanh.f32 %v483_v21 }
 0x115   : > { %v484_v33 = vpop.f32.mrf.mxu2  ;;  %1373 = vtanh.f32 %v463_v28 }
 0x116   : > { %v504_v37 = vpop.f32.mrf.mxu3  ;;  %1375 = vtanh.f32 %v480_v30  ;;  %v485_v50 = vadd.f32 %v1909_v56, %v484_v33 }
 0x117   : > { %v505_v38 = vadd.f32 %v1909_v56, %v504_v37  ;;  %v447_v39 = vpop.f32.mrf.mxu0 }
 0x118   : > { %v448_v41 = vadd.f32 %v1909_v56, %v447_v39  ;;  %v467_v42 = vpop.f32.mrf.mxu1 }
 0x119   : > { %v1370_v43 = vpop.eup %1369  ;;  %1377 = vtanh.f32 %v505_v38  ;;  %v468_v46 = vadd.f32 %v1909_v56, %v467_v42 }
 0x11a   : > { %587 = vadd.xlane.f32.xlu2 %v551_v36  ;;  %585 = vadd.xlane.f32.xlu1 %v550_v40  ;;  %1379 = vtanh.f32 %v448_v41  ;;  %v560_v48 = vmul.f32 %v1370_v43, %v1916_v62  ;;  %v1372_v49 = vpop.eup %1371 }
 0x11b   : > { %633 = vadd.xlane.f32.xlu0 %v574_v45  ;;  %1381 = vtanh.f32 %v468_v46  ;;  %v1374_v51 = vpop.eup %1373  ;;  %v567_v54 = vmul.f32 %v1372_v49, %v1916_v62 }
 0x11c   : > { %v1376_v52 = vpop.eup %1375  ;;  %1383 = vtanh.f32 %v503_v44  ;;  %v559_v59 = vmul.f32 %v1374_v51, %v1916_v62 }
 0x11d   : > { %v487_v53 = vpop.f32.mrf.mxu2  ;;  %1385 = vtanh.f32 %v445_v47  ;;  %v566_v0 = vmul.f32 %v1376_v52, %v1916_v62 }
 0x11e   : > { %v488_v55 = vadd.f32 %v1909_v56, %v487_v53  ;;  %v507_v57 = vpop.f32.mrf.mxu3  ;;  %1387 = vtanh.f32 %v485_v50 }
 0x11f   : > { %v1378_v58 = vpop.eup %1377  ;;  %v449_v60 = vpop.f32.mrf.mxu0  ;;  %v508_v61 = vadd.f32 %v1909_v56, %v507_v57 }
 0x120   : > { %v1380_v63 = vpop.eup %1379  ;;  %1389 = vtanh.f32 %v488_v55  ;;  %v450_v1 = vadd.f32 %v1909_v56, %v449_v60  ;;  %v469_v2 = vpop.f32.mrf.mxu1  ;;  %v576_v3 = vmul.f32 %v1378_v58, %v1916_v62 }
 0x121   : > { %v1382_v4 = vpop.eup %1381  ;;  %v470_v5 = vadd.f32 %v1909_v56, %v469_v2  ;;  %1391 = vtanh.f32 %v508_v61  ;;  %v553_v6 = vmul.f32 %v1380_v63, %v1916_v62 }
 0x122   : > { %619 = vadd.xlane.f32.xlu2 %v567_v54  ;;  %617 = vadd.xlane.f32.xlu1 %v566_v0  ;;  %1393 = vtanh.f32 %v450_v1  ;;  %v561_v7 = vmul.f32 %v1382_v4, %v1916_v62  ;;  %v1384_v16 = vpop.eup %1383 }
 0x123   : > { %603 = vadd.xlane.f32.xlu0 %v559_v59  ;;  %1395 = vtanh.f32 %v470_v5  ;;  %v1386_v17 = vpop.eup %1385  ;;  %v575_v24 = vmul.f32 %v1384_v16, %v1916_v62 }
 0x124   : > { %v1388_v18 = vpop.eup %1387  ;;  %v552_v36 = vmul.f32 %v1386_v17, %v1916_v62 }
 0x125   : > { %v489_v19 = vpop.f32.mrf.mxu2  ;;  %v568_v39 = vmul.f32 %v1388_v18, %v1916_v62 }
 0x126   : > { %v1390_v21 = vpop.eup %1389  ;;  %v490_v28 = vadd.f32 %v1909_v56, %v489_v19  ;;  %v509_v29 = vpop.f32.mrf.mxu3 }
 0x127   : > { %v1392_v30 = vpop.eup %1391  ;;  %v510_v31 = vadd.f32 %v1909_v56, %v509_v29  ;;  %v569_v33 = vmul.f32 %v1390_v21, %v1916_v62 }
 0x128   : > { %v1394_v35 = vpop.eup %1393  ;;  %1397 = vtanh.f32 %v490_v28  ;;  %v577_v37 = vmul.f32 %v1392_v30, %v1916_v62 }
 0x129   : > { %v1396_v38 = vpop.eup %1395  ;;  %1399 = vtanh.f32 %v510_v31  ;;  %v554_v40 = vmul.f32 %v1394_v35, %v1916_v62 }
 0x12a   : > { %589 = vadd.xlane.f32.xlu2 %v552_v36  ;;  %635 = vadd.xlane.f32.xlu1 %v575_v24  ;;  %v562_v41 = vmul.f32 %v1396_v38, %v1916_v62 }
 0x12b   : > { %621 = vadd.xlane.f32.xlu0 %v568_v39 }
 0x12e   : > { %v1398_v56 = vpop.eup %1397 }
 0x12f   : > { %v1400_v42 = vpop.eup %1399  ;;  %v570_v43 = vmul.f32 %v1398_v56, %v1916_v62 }
 0x130   : > { %v578_v44 = vmul.f32 %v1400_v42, %v1916_v62 }
 0x132   : > { %607 = vadd.xlane.f32.xlu2 %v561_v7  ;;  %605 = vadd.xlane.f32.xlu1 %v560_v48 }
 0x133   : > { %591 = vadd.xlane.f32.xlu0 %v553_v6 }
 0x13a   : > { %625 = vadd.xlane.f32.xlu2 %v570_v43  ;;  %623 = vadd.xlane.f32.xlu1 %v569_v33 }
 0x13b   : > { %609 = vadd.xlane.f32.xlu0 %v562_v41 }
 0x142   : > { %637 = vadd.xlane.f32.xlu2 %v576_v3  ;;  %593 = vadd.xlane.f32.xlu1 %v554_v40 }
 0x143   : > { %639 = vadd.xlane.f32.xlu0 %v577_v37 }
 0x14a   : > { %641 = vadd.xlane.f32.xlu1 %v578_v44 }
 0x166   : > { %v580_v45 = vpop.xlane.xlu0 %579 }
 0x167   : > { %v596_v46 = vpop.xlane.xlu2 %595 }
 0x16c   : > { %v612_v47 = vpop.xlane.xlu1 %611 }
 0x16d   : > { %v643_v49 = vsub.f32 %v580_v45, %v612_v47 }
 0x16e   : > { %v628_v50 = vpop.xlane.xlu0 %627 }
 0x16f   : > { %v1211_v51 = vmul.f32 -1.442695, %v643_v49  ;;  %v651_v52 = vsub.f32 %v596_v46, %v628_v50 }
 0x171   : > { %1401 = vpow2.f32 %v1211_v51  ;;  %v1219_v53 = vmul.f32 -1.442695, %v651_v52 }
 0x173   : > { %1403 = vpow2.f32 %v1219_v53 }
 0x174   : > { %v614_v62 = vpop.xlane.xlu2 %613 }
 0x175   : > { %v630_v48 = vpop.xlane.xlu1 %629 }
 0x176   : > { %v582_v54 = vpop.xlane.xlu0 %581 }
 0x177   : > { %v1402_v55 = vpop.eup %1401  ;;  %v644_v57 = vsub.f32 %v582_v54, %v614_v62 }
 0x178   : > { %v707_v58 = vadd.f32 1.0, %v1402_v55 }
 0x179   : > { %v1404_v59 = vpop.eup %1403  ;;  %v1212_v60 = vmul.f32 -1.442695, %v644_v57 }
 0x17a   : > { %1405 = vrcp.f32 %v707_v58  ;;  %v715_v61 = vadd.f32 1.0, %v1404_v59  ;;  %v734_v18 = vand.u32 2147483648, %v707_v58  ;;  %v732_v24 = vand.u32 2147483647, %v707_v58 }
 0x17b   : > { %1407 = vpow2.f32 %v1212_v60  ;;  %vm728_vm1 = vweird.f32 %v707_v58 }
 0x17c   : > { %1409 = vrcp.f32 %v715_v61  ;;  %v735_v36 = vor.u32 1.1754944e-38, %v734_v18  ;;  %v854_v37 = vand.u32 2147483648, %v715_v61  ;;  %v852_v40 = vand.u32 2147483647, %v715_v61 }
 0x17d   : > { %v632_v63 = vpop.xlane.xlu2 %631  ;;  %v584_v0 = vpop.xlane.xlu1 %583  ;;  %vm733_vm4 = vcmp.eq.f32.partialorder %v732_v24, 8.507059e+37  ;;  %vm848_vm5 = vweird.f32 %v715_v61 }
 0x17e   : > { %v598_v1 = vpop.xlane.xlu0 %597  ;;  %v855_v50 = vor.u32 1.1754944e-38, %v854_v37  ;;  %vm853_vm7 = vcmp.eq.f32.partialorder %v852_v40, 8.507059e+37 }
 0x17f   : > { %v652_v2 = vsub.f32 %v598_v1, %v630_v48 }
 0x180   : > { %v1406_v3 = vpop.eup %1405 }
 0x181   : > { %v1408_v4 = vpop.eup %1407  ;;  %v724_v5 = vmul.f32 %v1406_v3, %v707_v58  ;;  %v1220_v6 = vmul.f32 -1.442695, %v652_v2  ;;  %vm729_vm0 = vweird.f32 %v1406_v3 }
 0x182   : > { %v1980_v7 = vadd.f32 1.0, %v1408_v4  ;;  %v1410_v16 = vpop.eup %1409  ;;  %vm730_vm2 = vmor %vm728_vm1, %vm729_vm0 }
 0x183   : > { %v725_v17 = vsub.f32 1.0, %v724_v5  ;;  %1411 = vpow2.f32 %v1220_v6  ;;  %v844_v19 = vmul.f32 %v1410_v16, %v715_v61  ;;  %vm849_vm3 = vweird.f32 %v1410_v16 }
 0x184   : > { %1413 = vrcp.f32 %v1980_v7  ;;  %vm850_vm6 = vmor %vm848_vm5, %vm849_vm3  ;;  %v747_v59 = vand.u32 2147483647, %v1980_v7  ;;  %v749_v60 = vand.u32 2147483648, %v1980_v7  ;;  %vm743_vm9 = vweird.f32 %v1980_v7 }
 0x185   : > { %v726_v21 = vmul.f32 %v1406_v3, %v725_v17  ;;  %v602_v28 = vpop.xlane.xlu2 %601  ;;  %v600_v29 = vpop.xlane.xlu1 %599  ;;  %v845_v30 = vsub.f32 1.0, %v844_v19 }
 0x186   : > { %v653_v31 = vsub.f32 %v600_v29, %v632_v63  ;;  %v616_v33 = vpop.xlane.xlu0 %615  ;;  %vm748_vm11 = vcmp.eq.f32.partialorder %v747_v59, 8.507059e+37 }
 0x187   : > { %v727_v35 = vadd.f32 %v1406_v3, %v726_v21  ;;  %v645_v38 = vsub.f32 %v584_v0, %v616_v33  ;;  %v846_v39 = vmul.f32 %v1410_v16, %v845_v30 }
 0x188   : > { %v1221_v41 = vmul.f32 -1.442695, %v653_v31 }
 0x189   : > { %v1412_v56 = vpop.eup %1411  ;;  %v731_v42 = vsel %vm730_vm2, %v1406_v3, %v727_v35  ;;  %v1213_v43 = vmul.f32 -1.442695, %v645_v38  ;;  %v847_v46 = vadd.f32 %v1410_v16, %v846_v39 }
 0x18a   : > { %v1414_v44 = vpop.eup %1413  ;;  %v736_v45 = vsel %vm733_vm4, %v735_v36, %v731_v42  ;;  %v1983_v47 = vadd.f32 1.0, %v1412_v56  ;;  %1415 = vpow2.f32 %v1221_v41 }
 0x18b   : > { %v979_v49 = vsub.f32 1.0, %v736_v45  ;;  %v739_v51 = vmul.f32 %v1414_v44, %v1980_v7  ;;  %v851_v52 = vsel %vm850_vm6, %v1410_v16, %v847_v46  ;;  %v963_v53 = vmul.f32 %v736_v45, %v1827_v8 }
 0x18c   : > { %1417 = vrcp.f32 %v1983_v47  ;;  %v856_v48 = vsel %vm853_vm7, %v855_v50, %v851_v52  ;;  %vm744_vm8 = vweird.f32 %v1414_v44  ;;  %v750_v16 = vor.u32 1.1754944e-38, %v749_v60 }
 0x18d   : > { %v995_v62 = vmul.f32 %v979_v49, %v1833_v10  ;;  %v740_v54 = vsub.f32 1.0, %v739_v51  ;;  %v588_v55 = vpop.xlane.xlu2 %587  ;;  %v586_v57 = vpop.xlane.xlu1 %585  ;;  %v987_v58 = vsub.f32 1.0, %v856_v48  ;;  %1419 = vpow2.f32 %v1213_v43  ;;  %vm745_vm10 = vmor %vm743_vm9, %vm744_vm8 }
 0x18e   : > { %v634_v61 = vpop.xlane.xlu0 %633  ;;  %v971_v8 = vmul.f32 %v856_v48, %v1845_v14  ;;  %v867_v7 = vand.u32 2147483647, %v1983_v47  ;;  %v869_v31 = vand.u32 2147483648, %v1983_v47  ;;  %vm863_vm13 = vweird.f32 %v1983_v47 }
 0x18f   : > { %v1011_v63 = vadd.f32 %v995_v62, %v963_v53  ;;  %v741_v0 = vmul.f32 %v1414_v44, %v740_v54  ;;  %v654_v1 = vsub.f32 %v602_v28, %v634_v61  ;;  %v1003_v10 = vmul.f32 %v987_v58, %v1839_v12 }
 0x190   : > { %v1416_v2 = vpop.eup %1415  ;;  %vm868_vm15 = vcmp.eq.f32.partialorder %v867_v7, 8.507059e+37  ;;  %v870_v43 = vor.u32 1.1754944e-38, %v869_v31 }
 0x191   : > { %1027 = vst [vmem:[%s1994_s26] sm:$0xff] %v1011_v63  ;;  %v742_v3 = vadd.f32 %v1414_v44, %v741_v0  ;;  %v1998_v4 = vadd.f32 1.0, %v1416_v2  ;;  %v1019_v6 = vadd.f32 %v1003_v10, %v971_v8  ;;  %v1222_v17 = vmul.f32 -1.442695, %v654_v1 }
 0x192   : > { %v1418_v5 = vpop.eup %1417 }
 0x193   : > { %v746_v18 = vsel %vm745_vm10, %v1414_v44, %v742_v3  ;;  %v859_v14 = vmul.f32 %v1418_v5, %v1983_v47  ;;  %1421 = vrcp.f32 %v1998_v4  ;;  %v1420_v12 = vpop.eup %1419  ;;  %1035 = vst [vmem:[%s1994_s26 + $0x40] sm:$0xff] %v1019_v6  ;;  %vm864_vm12 = vweird.f32 %v1418_v5 }
 0x194   : > { %v751_v19 = vsel %vm748_vm11, %v750_v16, %v746_v18  ;;  %v2004_v28 = vadd.f32 1.0, %v1420_v12  ;;  %1423 = vpow2.f32 %v1222_v17  ;;  %vm865_vm14 = vmor %vm863_vm13, %vm864_vm12  ;;  %v884_v51 = vand.u32 2147483648, %v1998_v4 }
 0x195   : > { %v980_v21 = vsub.f32 1.0, %v751_v19  ;;  %v860_v24 = vsub.f32 1.0, %v859_v14  ;;  %v620_v29 = vpop.xlane.xlu2 %619  ;;  %v618_v30 = vpop.xlane.xlu1 %617  ;;  %v964_v36 = vmul.f32 %v751_v19, %v1830_v9  ;;  %vm878_vm0 = vweird.f32 %v1998_v4 }
 0x196   : > { %v647_v33 = vsub.f32 %v588_v55, %v620_v29  ;;  %v604_v35 = vpop.xlane.xlu0 %603  ;;  %1425 = vrcp.f32 %v2004_v28  ;;  %v646_v40 = vsub.f32 %v586_v57, %v618_v30  ;;  %v885_v0 = vor.u32 1.1754944e-38, %v884_v51 }
 0x197   : > { %v996_v37 = vmul.f32 %v980_v21, %v1836_v11  ;;  %v861_v38 = vmul.f32 %v1418_v5, %v860_v24  ;;  %v882_v11 = vand.u32 2147483647, %v1998_v4  ;;  %vm758_vm5 = vweird.f32 %v2004_v28 }
 0x198   : > { %v1215_v39 = vmul.f32 -1.442695, %v647_v33  ;;  %v1214_v45 = vmul.f32 -1.442695, %v646_v40 }
 0x199   : > { %v1422_v41 = vpop.eup %1421  ;;  %v1012_v56 = vadd.f32 %v996_v37, %v964_v36  ;;  %v862_v42 = vadd.f32 %v1418_v5, %v861_v38  ;;  %vm2022_vm2 = vcmp.eq.f32.partialorder %v882_v11, 8.507059e+37 }
 0x19a   : > { %v874_v44 = vmul.f32 %v1422_v41, %v1998_v4  ;;  %1427 = vpow2.f32 %v1215_v39  ;;  %v1424_v46 = vpop.eup %1423  ;;  %vm879_vm1 = vweird.f32 %v1422_v41 }
 0x19b   : > { %1028 = vst [vmem:[%s1994_s26 + $0x8] sm:$0xff] %v1012_v56  ;;  %v866_v9 = vsel %vm865_vm14, %v1418_v5, %v862_v42  ;;  %v2017_v47 = vadd.f32 1.0, %v1424_v46  ;;  %1429 = vpow2.f32 %v1214_v45  ;;  %vm880_vm3 = vmor %vm878_vm0, %vm879_vm1 }
 0x19c   : > { %v871_v49 = vsel %vm868_vm15, %v870_v43, %v866_v9  ;;  %v875_v50 = vsub.f32 1.0, %v874_v44  ;;  %v1426_v52 = vpop.eup %1425 }
 0x19d   : > { %v988_v53 = vsub.f32 1.0, %v871_v49  ;;  %v590_v62 = vpop.xlane.xlu2 %589  ;;  %v636_v48 = vpop.xlane.xlu1 %635  ;;  %v754_v55 = vmul.f32 %v1426_v52, %v2004_v28  ;;  %v972_v59 = vmul.f32 %v871_v49, %v1848_v15  ;;  %1431 = vrcp.f32 %v2017_v47 }
 0x19e   : > { %v876_v54 = vmul.f32 %v1422_v41, %v875_v50  ;;  %v655_v57 = vsub.f32 %v604_v35, %v636_v48  ;;  %v622_v58 = vpop.xlane.xlu0 %621  ;;  %v762_v15 = vand.u32 2147483647, %v2004_v28  ;;  %vm759_vm4 = vweird.f32 %v1426_v52 }
 0x19f   : > { %v1004_v60 = vmul.f32 %v988_v53, %v1842_v13  ;;  %v755_v1 = vsub.f32 1.0, %v754_v55  ;;  %v764_v13 = vand.u32 2147483648, %v2004_v28  ;;  %v648_v3 = vsub.f32 %v590_v62, %v622_v58  ;;  %vm760_vm6 = vmor %vm758_vm5, %vm759_vm4 }
 0x1a0   : > { %v877_v63 = vadd.f32 %v1422_v41, %v876_v54  ;;  %v1223_v2 = vmul.f32 -1.442695, %v655_v57  ;;  %v1428_v8 = vpop.eup %1427  ;;  %vm763_vm7 = vcmp.eq.f32.partialorder %v762_v15, 8.507059e+37  ;;  %v897_v37 = vand.u32 2147483647, %v2017_v47 }
 0x1a1   : > { %v1020_v10 = vadd.f32 %v1004_v60, %v972_v59  ;;  %v756_v6 = vmul.f32 %v1426_v52, %v755_v1  ;;  %v2031_v16 = vadd.f32 1.0, %v1428_v8  ;;  %v1430_v17 = vpop.eup %1429  ;;  %v765_v19 = vor.u32 1.1754944e-38, %v764_v13 }
 0x1a2   : > { %v881_v5 = vsel %vm880_vm3, %v1422_v41, %v877_v63  ;;  %1433 = vpow2.f32 %v1223_v2  ;;  %v2038_v21 = vadd.f32 1.0, %v1430_v17  ;;  %v1216_v24 = vmul.f32 -1.442695, %v648_v3 }
 0x1a3   : > { %1036 = vst [vmem:[%s1994_s26 + $0x48] sm:$0xff] %v1020_v10  ;;  %v886_v18 = vsel %vm2022_vm2, %v885_v0, %v881_v5  ;;  %v757_v12 = vadd.f32 %v1426_v52, %v756_v6  ;;  %1435 = vrcp.f32 %v2031_v16  ;;  %v1432_v4 = vpop.eup %1431  ;;  %v899_v41 = vand.u32 2147483648, %v2017_v47 }
 0x1a4   : > { %v989_v14 = vsub.f32 1.0, %v886_v18  ;;  %v973_v30 = vmul.f32 %v886_v18, %v1873_v26  ;;  %v889_v28 = vmul.f32 %v1432_v4, %v2017_v47  ;;  %1437 = vrcp.f32 %v2038_v21 }
 0x1a5   : > { %v2040_v7 = vpop.xlane.xlu2 %607  ;;  %v2042_v29 = vpop.xlane.xlu1 %605  ;;  %v761_v33 = vsel %vm760_vm6, %v1426_v52, %v757_v12  ;;  %vm894_vm8 = vweird.f32 %v1432_v4  ;;  %v792_v26 = vand.u32 2147483647, %v2031_v16  ;;  %1439 = vpow2.f32 %v1216_v24 }
 0x1a6   : > { %v1005_v31 = vmul.f32 %v989_v14, %v1863_v22  ;;  %v592_v35 = vpop.xlane.xlu0 %591  ;;  %v766_v36 = vsel %vm763_vm7, %v765_v19, %v761_v33  ;;  %v890_v40 = vsub.f32 1.0, %v889_v28  ;;  %v794_v22 = vand.u32 2147483648, %v2031_v16 }
 0x1a7   : > { %v981_v39 = vsub.f32 1.0, %v766_v36  ;;  %v965_v43 = vmul.f32 %v766_v36, %v1859_v20  ;;  %vm893_vm9 = vweird.f32 %v2017_v47  ;;  %vm2058_vm10 = vcmp.eq.f32.partialorder %v897_v37, 8.507059e+37 }
 0x1a8   : > { %v1021_v38 = vadd.f32 %v1005_v31, %v973_v30  ;;  %v1434_v56 = vpop.eup %1433  ;;  %v891_v9 = vmul.f32 %v1432_v4, %v890_v40  ;;  %v900_v51 = vor.u32 1.1754944e-38, %v899_v41  ;;  %vm895_vm11 = vmor %vm893_vm9, %vm894_vm8  ;;  %vm788_vm12 = vweird.f32 %v2031_v16 }
 0x1a9   : > { %v1436_v42 = vpop.eup %1435  ;;  %v997_v44 = vmul.f32 %v981_v39, %v1866_v23  ;;  %v2055_v11 = vadd.f32 1.0, %v1434_v56  ;;  %vm2066_vm13 = vcmp.eq.f32.partialorder %v792_v26, 8.507059e+37  ;;  %v777_v53 = vand.u32 2147483647, %v2038_v21 }
 0x1aa   : > { %1037 = vst [vmem:[%s1994_s26 + $0x50] sm:$0xff] %v1021_v38  ;;  %v784_v46 = vmul.f32 %v1436_v42, %v2031_v16  ;;  %v892_v50 = vadd.f32 %v1432_v4, %v891_v9  ;;  %v1438_v20 = vpop.eup %1437  ;;  %v795_v54 = vor.u32 1.1754944e-38, %v794_v22  ;;  %vm789_vm14 = vweird.f32 %v1436_v42 }
 0x1ab   : > { %v1013_v49 = vadd.f32 %v997_v44, %v965_v43  ;;  %1441 = vrcp.f32 %v2055_v11  ;;  %v769_v55 = vmul.f32 %v1438_v20, %v2038_v21  ;;  %v1440_v59 = vpop.eup %1439  ;;  %v779_v63 = vand.u32 2147483648, %v2038_v21  ;;  %vm790_vm2 = vmor %vm788_vm12, %vm789_vm14 }
 0x1ac   : > { %v785_v23 = vsub.f32 1.0, %v784_v46  ;;  %v896_v48 = vsel %vm895_vm11, %v1432_v4, %v892_v50  ;;  %vm773_vm15 = vweird.f32 %v2038_v21  ;;  %v2081_v2 = vadd.f32 1.0, %v1440_v59 }
 0x1ad   : > { %v2071_v47 = vpop.xlane.xlu2 %625  ;;  %v624_v62 = vpop.xlane.xlu1 %623  ;;  %1029 = vst [vmem:[%s1994_s26 + $0x10] sm:$0xff] %v1013_v49  ;;  %v901_v60 = vsel %vm2058_vm10, %v900_v51, %v896_v48  ;;  %v770_v1 = vsub.f32 1.0, %v769_v55  ;;  %vm774_vm0 = vweird.f32 %v1438_v20  ;;  %vm2084_vm1 = vcmp.eq.f32.partialorder %v777_v53, 8.507059e+37 }
 0x1ae   : > { %v649_v57 = vsub.f32 %v592_v35, %v624_v62  ;;  %v2075_v58 = vpop.xlane.xlu0 %609  ;;  %v786_v61 = vmul.f32 %v1436_v42, %v785_v23  ;;  %v990_v0 = vsub.f32 1.0, %v901_v60  ;;  %v974_v8 = vmul.f32 %v901_v60, %v1876_v27  ;;  %vm775_vm4 = vmor %vm773_vm15, %vm774_vm0 }
 0x1af   : > { %v771_v5 = vmul.f32 %v1438_v20, %v770_v1  ;;  %1443 = vrcp.f32 %v2081_v2  ;;  %v780_v18 = vor.u32 1.1754944e-38, %v779_v63  ;;  %vm908_vm3 = vweird.f32 %v2055_v11 }
 0x1b0   : > { %v787_v10 = vadd.f32 %v1436_v42, %v786_v61  ;;  %v1006_v3 = vmul.f32 %v990_v0, %v1870_v25  ;;  %v1217_v6 = vmul.f32 -1.442695, %v649_v57  ;;  %v914_v25 = vand.u32 2147483648, %v2055_v11  ;;  %v1468_v57 = vld [vmem:[%s1816_s11 + $0x60] sm:$0xff] }
 0x1b1   : > { %v1442_v13 = vpop.eup %1441  ;;  %v772_v4 = vadd.f32 %v1438_v20, %v771_v5  ;;  %v912_v24 = vand.u32 2147483647, %v2055_v11  ;;  %v807_v50 = vand.u32 2147483647, %v2081_v2  ;;  %v809_v52 = vand.u32 2147483648, %v2081_v2 }
 0x1b2   : > { %v791_v17 = vsel %vm790_vm2, %v1436_v42, %v787_v10  ;;  %v904_v27 = vmul.f32 %v1442_v13, %v2055_v11  ;;  %v1022_v14 = vadd.f32 %v1006_v3, %v974_v8  ;;  %vm909_vm5 = vweird.f32 %v1442_v13  ;;  %v1465_v42 = vld [vmem:[%s1808_s0 + $0x18] sm:$0xff] }
 0x1b3   : > { %v796_v12 = vsel %vm2066_vm13, %v795_v54, %v791_v17  ;;  %v776_v28 = vsel %vm775_vm4, %v1438_v20, %v772_v4  ;;  %1445 = vpow2.f32 %v1217_v6  ;;  %v915_v56 = vor.u32 1.1754944e-38, %v914_v25  ;;  %vm910_vm6 = vmor %vm908_vm3, %vm909_vm5  ;;  %v1467_v54 = vld [vmem:[%s1808_s0 + $0x60] sm:$0xff]  ;;  %v1469_v6 = vld [vmem:[%s1808_s0 + $0x28] sm:$0xff] }
 0x1b4   : > { %v983_v16 = vsub.f32 1.0, %v796_v12  ;;  %v905_v19 = vsub.f32 1.0, %v904_v27  ;;  %1038 = vst [vmem:[%s1994_s26 + $0x58] sm:$0xff] %v1022_v14  ;;  %v967_v33 = vmul.f32 %v796_v12, %v1885_v32  ;;  %v781_v21 = vsel %vm2084_vm1, %v780_v18, %v776_v28  ;;  %v1470_v18 = vld [vmem:[%s1816_s11 + $0x28] sm:$0xff] }
 0x1b5   : > { %v638_v30 = vpop.xlane.xlu2 %637  ;;  %v594_v31 = vpop.xlane.xlu1 %593  ;;  %v982_v41 = vsub.f32 1.0, %v781_v21  ;;  %vm913_vm7 = vcmp.eq.f32.partialorder %v912_v24, 8.507059e+37  ;;  %vm803_vm9 = vweird.f32 %v2081_v2  ;;  %v810_v63 = vor.u32 1.1754944e-38, %v809_v52 }
 0x1b6   : > { %v656_v35 = vsub.f32 %v2042_v29, %v638_v30  ;;  %v640_v36 = vpop.xlane.xlu0 %639  ;;  %v999_v37 = vmul.f32 %v983_v16, %v1889_v34  ;;  %v906_v38 = vmul.f32 %v1442_v13, %v905_v19  ;;  %v650_v39 = vsub.f32 %v594_v31, %v2071_v47  ;;  %v1444_v40 = vpop.eup %1443  ;;  %v1466_v34 = vld [vmem:[%s1816_s11 + $0x18] sm:$0xff] }
 0x1b7   : > { %v657_v32 = vsub.f32 %v2040_v7, %v640_v36  ;;  %v966_v29 = vmul.f32 %v1465_v42, %v781_v21  ;;  %v799_v44 = vmul.f32 %v1444_v40, %v2081_v2  ;;  %v998_v9 = vmul.f32 %v1466_v34, %v982_v41 }
 0x1b8   : > { %v1224_v26 = vmul.f32 -1.442695, %v656_v35  ;;  %v1015_v22 = vadd.f32 %v999_v37, %v967_v33  ;;  %v907_v43 = vadd.f32 %v1442_v13, %v906_v38  ;;  %v1218_v45 = vmul.f32 -1.442695, %v650_v39 }
 0x1b9   : > { %v1225_v46 = vmul.f32 -1.442695, %v657_v32  ;;  %v800_v7 = vsub.f32 1.0, %v799_v44  ;;  %v1446_v51 = vpop.eup %1445  ;;  %v1014_v20 = vadd.f32 %v998_v9, %v966_v29  ;;  %vm804_vm8 = vweird.f32 %v1444_v40 }
 0x1ba   : > { %1447 = vpow2.f32 %v1224_v26  ;;  %1031 = vst [vmem:[%s1994_s26 + $0x20] sm:$0xff] %v1015_v22  ;;  %v911_v49 = vsel %vm910_vm6, %v1442_v13, %v907_v43  ;;  %v713_v47 = vadd.f32 1.0, %v1446_v51  ;;  %vm805_vm10 = vmor %vm803_vm9, %vm804_vm8  ;;  %vm808_vm11 = vcmp.eq.f32.partialorder %v807_v50, 8.507059e+37  ;;  %v1471_v51 = vld [vmem:[%s1808_s0 + $0x30] sm:$0xff] }
 0x1bb   : > { %v916_v23 = vsel %vm913_vm7, %v915_v56, %v911_v49  ;;  %1449 = vpow2.f32 %v1218_v45  ;;  %v801_v53 = vmul.f32 %v1444_v40, %v800_v7  ;;  %1030 = vst [vmem:[%s1994_s26 + $0x18] sm:$0xff] %v1014_v20 }
 0x1bc   : > { %v991_v11 = vsub.f32 1.0, %v916_v23  ;;  %1451 = vpow2.f32 %v1225_v46  ;;  %v975_v55 = vmul.f32 %v1467_v54, %v916_v23  ;;  %v822_v25 = vand.u32 2147483647, %v713_v47 }
 0x1bd   : > { %v642_v62 = vpop.xlane.xlu1 %641  ;;  %v802_v60 = vadd.f32 %v1444_v40, %v801_v53  ;;  %1453 = vrcp.f32 %v713_v47  ;;  %v824_v24 = vand.u32 2147483648, %v713_v47  ;;  %vm818_vm13 = vweird.f32 %v713_v47 }
 0x1be   : > { %v658_v48 = vsub.f32 %v2075_v58, %v642_v62  ;;  %v1007_v59 = vmul.f32 %v1468_v57, %v991_v11  ;;  %vm2135_vm14 = vcmp.eq.f32.partialorder %v822_v25, 8.507059e+37  ;;  %v1472_v11 = vld [vmem:[%s1816_s11 + $0x30] sm:$0xff] }
 0x1bf   : > { %v806_v8 = vsel %vm805_vm10, %v1444_v40, %v802_v60  ;;  %v825_v39 = vor.u32 1.1754944e-38, %v824_v24  ;;  %v1476_v24 = vld [vmem:[%s1816_s11 + $0x38] sm:$0xff] }
 0x1c0   : > { %v1448_v61 = vpop.eup %1447  ;;  %v1226_v0 = vmul.f32 -1.442695, %v658_v48  ;;  %v1023_v1 = vadd.f32 %v1007_v59, %v975_v55  ;;  %v811_v15 = vsel %vm808_vm11, %v810_v63, %v806_v8 }
 0x1c1   : > { %v720_v2 = vadd.f32 1.0, %v1448_v61  ;;  %v1450_v10 = vpop.eup %1449  ;;  %v984_v58 = vsub.f32 1.0, %v811_v15  ;;  %v968_v17 = vmul.f32 %v1469_v6, %v811_v15 }
 0x1c2   : > { %1455 = vpow2.f32 %v1226_v0  ;;  %1039 = vst [vmem:[%s1994_s26 + $0x60] sm:$0xff] %v1023_v1  ;;  %v1452_v13 = vpop.eup %1451  ;;  %v2124_v3 = vadd.f32 1.0, %v1450_v10  ;;  %v1473_v10 = vld [vmem:[%s1808_s0 + $0x68] sm:$0xff] }
 0x1c3   : > { %1457 = vrcp.f32 %v720_v2  ;;  %v1454_v5 = vpop.eup %1453  ;;  %v1000_v27 = vmul.f32 %v1470_v18, %v984_v58  ;;  %v2128_v14 = vadd.f32 1.0, %v1452_v13  ;;  %v927_v31 = vand.u32 2147483647, %v720_v2  ;;  %v1474_v58 = vld [vmem:[%s1816_s11 + $0x68] sm:$0xff] }
 0x1c4   : > { %v814_v12 = vmul.f32 %v1454_v5, %v713_v47  ;;  %1459 = vrcp.f32 %v2124_v3  ;;  %v929_v33 = vand.u32 2147483648, %v720_v2  ;;  %vm819_vm12 = vweird.f32 %v1454_v5 }
 0x1c5   : > { %v1016_v4 = vadd.f32 %v1000_v27, %v968_v17  ;;  %1461 = vrcp.f32 %v2128_v14  ;;  %v837_v21 = vand.u32 2147483647, %v2124_v3  ;;  %vm923_vm15 = vweird.f32 %v720_v2  ;;  %vm820_vm0 = vmor %vm818_vm13, %vm819_vm12 }
 0x1c6   : > { %v815_v19 = vsub.f32 1.0, %v814_v12  ;;  %vm2141_vm1 = vcmp.eq.f32.partialorder %v927_v31, 8.507059e+37  ;;  %v930_v26 = vor.u32 1.1754944e-38, %v929_v33  ;;  %vm833_vm2 = vweird.f32 %v2124_v3  ;;  %v1477_v33 = vld [vmem:[%s1808_s0 + $0x70] sm:$0xff] }
 0x1c7   : > { %1032 = vst [vmem:[%s1994_s26 + $0x28] sm:$0xff] %v1016_v4  ;;  %v839_v32 = vand.u32 2147483648, %v2124_v3  ;;  %vm2150_vm4 = vcmp.eq.f32.partialorder %v837_v21, 8.507059e+37  ;;  %vm938_vm5 = vweird.f32 %v2128_v14  ;;  %v942_v7 = vand.u32 2147483647, %v2128_v14 }
 0x1c8   : > { %v1456_v16 = vpop.eup %1455  ;;  %v816_v35 = vmul.f32 %v1454_v5, %v815_v19  ;;  %v944_v52 = vand.u32 2147483648, %v2128_v14 }
 0x1c9   : > { %v1458_v30 = vpop.eup %1457  ;;  %v2133_v28 = vadd.f32 1.0, %v1456_v16  ;;  %v840_v55 = vor.u32 1.1754944e-38, %v839_v32  ;;  %vm2164_vm9 = vcmp.eq.f32.partialorder %v942_v7, 8.507059e+37  ;;  %v1475_v16 = vld [vmem:[%s1808_s0 + $0x38] sm:$0xff] }
 0x1ca   : > { %v919_v36 = vmul.f32 %v1458_v30, %v720_v2  ;;  %v817_v38 = vadd.f32 %v1454_v5, %v816_v35  ;;  %v1460_v41 = vpop.eup %1459  ;;  %vm924_vm3 = vweird.f32 %v1458_v30  ;;  %v945_v1 = vor.u32 1.1754944e-38, %v944_v52 }
 0x1cb   : > { %1463 = vrcp.f32 %v2133_v28  ;;  %v1462_v22 = vpop.eup %1461  ;;  %v829_v43 = vmul.f32 %v1460_v41, %v2124_v3  ;;  %vm925_vm6 = vmor %vm923_vm15, %vm924_vm3  ;;  %vm834_vm7 = vweird.f32 %v1460_v41  ;;  %v957_v2 = vand.u32 2147483647, %v2133_v28 }
 0x1cc   : > { %v920_v40 = vsub.f32 1.0, %v919_v36  ;;  %v821_v42 = vsel %vm820_vm0, %v1454_v5, %v817_v38  ;;  %v934_v9 = vmul.f32 %v1462_v22, %v2128_v14  ;;  %vm939_vm8 = vweird.f32 %v1462_v22  ;;  %vm835_vm10 = vmor %vm833_vm2, %vm834_vm7  ;;  %v1478_v36 = vld [vmem:[%s1816_s11 + $0x70] sm:$0xff] }
 0x1cd   : > { %v826_v44 = vsel %vm2135_vm14, %v825_v39, %v821_v42  ;;  %v830_v49 = vsub.f32 1.0, %v829_v43  ;;  %vm940_vm11 = vmor %vm938_vm5, %vm939_vm8  ;;  %v959_v3 = vand.u32 2147483648, %v2133_v28  ;;  %vm953_vm13 = vweird.f32 %v2133_v28 }
 0x1ce   : > { %v921_v29 = vmul.f32 %v1458_v30, %v920_v40  ;;  %v985_v45 = vsub.f32 1.0, %v826_v44  ;;  %v969_v20 = vmul.f32 %v1471_v51, %v826_v44  ;;  %v935_v23 = vsub.f32 1.0, %v934_v9 }
 0x1cf   : > { %v831_v62 = vmul.f32 %v1460_v41, %v830_v49  ;;  %v960_v31 = vor.u32 1.1754944e-38, %v959_v3  ;;  %vm958_vm15 = vcmp.eq.f32.partialorder %v957_v2, 8.507059e+37 }
 0x1d0   : > { %v922_v46 = vadd.f32 %v1458_v30, %v921_v29  ;;  %v1001_v53 = vmul.f32 %v1472_v11, %v985_v45  ;;  %v936_v57 = vmul.f32 %v1462_v22, %v935_v23 }
 0x1d1   : > { %v1464_v50 = vpop.eup %1463  ;;  %v832_v61 = vadd.f32 %v1460_v41, %v831_v62 }
 0x1d2   : > { %v926_v47 = vsel %vm925_vm6, %v1458_v30, %v922_v46  ;;  %v949_v48 = vmul.f32 %v1464_v50, %v2133_v28  ;;  %v1017_v59 = vadd.f32 %v1001_v53, %v969_v20  ;;  %v937_v0 = vadd.f32 %v1462_v22, %v936_v57 }
 0x1d3   : > { %v931_v54 = vsel %vm2141_vm1, %v930_v26, %v926_v47  ;;  %v836_v5 = vsel %vm835_vm10, %v1460_v41, %v832_v61  ;;  %vm954_vm12 = vweird.f32 %v1464_v50  ;;  %v1479_v41 = vld [vmem:[%s1808_s0 + $0x78] sm:$0xff] }
 0x1d4   : > { %v992_v60 = vsub.f32 1.0, %v931_v54  ;;  %v950_v8 = vsub.f32 1.0, %v949_v48  ;;  %1033 = vst [vmem:[%s1994_s26 + $0x30] sm:$0xff] %v1017_v59  ;;  %v976_v15 = vmul.f32 %v1473_v10, %v931_v54  ;;  %v841_v6 = vsel %vm2150_vm4, %v840_v55, %v836_v5  ;;  %vm955_vm14 = vmor %vm953_vm13, %vm954_vm12  ;;  %v1480_v26 = vld [vmem:[%s1816_s11 + $0x78] sm:$0xff] }
 0x1d5   : > { %v941_v17 = vsel %vm940_vm11, %v1462_v22, %v937_v0  ;;  %v986_v12 = vsub.f32 1.0, %v841_v6  ;;  %v970_v19 = vmul.f32 %v1475_v16, %v841_v6 }
 0x1d6   : > { %v1008_v13 = vmul.f32 %v1474_v58, %v992_v60  ;;  %v951_v18 = vmul.f32 %v1464_v50, %v950_v8  ;;  %v946_v4 = vsel %vm2164_vm9, %v945_v1, %v941_v17 }
 0x1d7   : > { %v993_v25 = vsub.f32 1.0, %v946_v4  ;;  %v1002_v30 = vmul.f32 %v1476_v24, %v986_v12  ;;  %v977_v35 = vmul.f32 %v1477_v33, %v946_v4 }
 0x1d8   : > { %v1024_v27 = vadd.f32 %v1008_v13, %v976_v15  ;;  %v952_v14 = vadd.f32 %v1464_v50, %v951_v18 }
 0x1d9   : > { %v1009_v28 = vmul.f32 %v1478_v36, %v993_v25  ;;  %v1018_v21 = vadd.f32 %v1002_v30, %v970_v19 }
 0x1da   : > { %1040 = vst [vmem:[%s1994_s26 + $0x68] sm:$0xff] %v1024_v27  ;;  %v956_v37 = vsel %vm955_vm14, %v1464_v50, %v952_v14 }
 0x1db   : > { %v961_v38 = vsel %vm958_vm15, %v960_v31, %v956_v37  ;;  %v1025_v39 = vadd.f32 %v1009_v28, %v977_v35  ;;  %1034 = vst [vmem:[%s1994_s26 + $0x38] sm:$0xff] %v1018_v21 }
 0x1dc   : > { %v994_v40 = vsub.f32 1.0, %v961_v38  ;;  %v978_v56 = vmul.f32 %v1479_v41, %v961_v38 }
 0x1dd   : > { %1041 = vst [vmem:[%s1994_s26 + $0x70] sm:$0xff] %v1025_v39 }
 0x1de   : > { %v1010_v32 = vmul.f32 %v1480_v26, %v994_v40 }
 0x1e0   : > { %v1026_v22 = vadd.f32 %v1010_v32, %v978_v56 }
 0x1e2   : > { %1042 = vst [vmem:[%s1994_s26 + $0x78] sm:$0xff] %v1026_v22 }
 0x1e3   : > { %1598 = shalt.err (!%p1595_p11)
}
 0x1e4   : > { %s1652_s20 = smov 128   ;;  %s1653_s11 = smov 8  }
 0x1e5   : > { %1275 = dma.vmem_to_hbm [thread:$0]  (%p1751_p7), %s1057_s2, 2048, %s1059_s23, %s1044_s8, %s1652_s20, %s1652_s20, %s1653_s11  }
 0x1e6 PF: > { %s1073_s24 = sand.u32 1, %s1633_s18   ;;  %p2262_p12 = scmp.ge.s32.totalorder %s1645_s21, 2 }
 0x1e7   : > { %s1074_s14 = scalar_lea.sflag [#allocation4], %s1073_s24 }
 0x1e8   : > { %p1289_p13 = pnand %p2262_p12, %p1719_p6 }
 0x1ea   : > { %p1290_p0 = pneg %p1289_p13 }
 0x1ec   : > { %1628 = dma.done.wait (%p1290_p0), %s1074_s14, 2048  }
 0x1ed   : > { %1630 = vsyncadd (%p1290_p0), %s1074_s14, 4294965248  ;;  %s2263_s15 = sld [smem:[#allocation13_spill]]  ;;  %p21_p3 = scmp.ge.s32.totalorder %s1737_s7, 4  }
 0x1ee   : > { %s2264_s20 = sld [smem:[#allocation14_spill]]  ;;  %s2265_s18 = smov %s1637_s19 }
 0x1ef   : > { %s2267_s21 = smov %s1737_s7  ;;  %23 = sbr.rel (!%p21_p3) target bundleno = 10 (0xa), region = 102 }
 0x1f3   : > { %s2266_s19 = smov %s2263_s15 }
 0x1f4   :  { %1080 = vsyncpa [#allocation3], 1 }
 0x1f5   :  { %1082 = vsyncpa [#allocation3 + $0x1], 1 }
 0x1f6   :  { %1083 = vsyncpa [#allocation6], 1 }
 0x1f7   :  { %1085 = vsyncpa [#allocation6 + $0x1], 1 }
 0x1f8   :  { %1086 = vsyncpa [#allocation4], 1 }
 0x1f9   :  { %1088 = vsyncpa [#allocation4 + $0x1], 1 }

</bundles_post_ra>
